<compile_context>
chip_gen: v7x
topology: tpu7x:2x2x1
jax: 0.10.0
libtpu: 0.0.40
codegen_flags: <defaults>
</compile_context>

<pallas_src>
import functools

import jax
import jax.numpy as jnp
from jax.experimental import pallas as pl
from jax.experimental.pallas import tpu as pltpu  # noqa: F401  (TPU backend)


BN_EPS = 1e-5

# Row indices inside the packed parameter-row section of the slab.
ROW_B1, ROW_GAMMA, ROW_BETA, ROW_BHEAD, ROW_B3, ROW_B4 = range(6)


def _round8(n):
    return ((n + 7) // 8) * 8


def _vae_kernel(F, E, H, offs, xe_ref, slab_ref, out_ref):
    o_w1, o_wh, o_w3, o_w4, o_rows = offs

    # --- unpack the two input blocks (static slices -> cheap views) ---
    x = xe_ref[:, :F]                                           # [B, F]
    eps = xe_ref[:, F:F + E]                                    # [B, E]

    w1 = slab_ref[o_w1:o_w1 + F, :H]                            # [F, H]
    whead = slab_ref[o_wh:o_wh + H, :2 * E]                     # [H, 2E]
    w3 = slab_ref[o_w3:o_w3 + E, :H]                            # [E, H]
    w4 = slab_ref[o_w4:o_w4 + H, :F]                            # [H, F]

    b1 = slab_ref[o_rows + ROW_B1:o_rows + ROW_B1 + 1, :H]
    gamma = slab_ref[o_rows + ROW_GAMMA:o_rows + ROW_GAMMA + 1, :H]
    beta = slab_ref[o_rows + ROW_BETA:o_rows + ROW_BETA + 1, :H]
    bhead = slab_ref[o_rows + ROW_BHEAD:o_rows + ROW_BHEAD + 1, :2 * E]
    b3 = slab_ref[o_rows + ROW_B3:o_rows + ROW_B3 + 1, :H]
    b4 = slab_ref[o_rows + ROW_B4:o_rows + ROW_B4 + 1, :F]

    # --- encode: layer1 -> batchnorm1 (training batch stats) -> relu ---
    h = jnp.dot(x, w1, preferred_element_type=jnp.float32) + b1
    mean = jnp.mean(h, axis=0, keepdims=True)                   # [1, H]
    hm = h - mean                                               # reused (one pass)
    var = jnp.mean(hm * hm, axis=0, keepdims=True)              # biased variance
    h = hm * (gamma * jax.lax.rsqrt(var + BN_EPS)) + beta       # fold gamma into scale
    h = jnp.maximum(h, 0.0)                                     # relu

    # --- fused mu|logvar head: one MXU pass, packed [B, 2E] ---
    mulv = jnp.dot(h, whead, preferred_element_type=jnp.float32) + bhead
    mu = mulv[:, :E]
    logvar = mulv[:, E:]

    # --- reparameterize: z = mu + eps * exp(0.5 * logvar) ---
    z = mu + eps * jnp.exp(0.5 * logvar)

    # --- decode: layer3 -> relu -> layer4 -> sigmoid ---
    z1 = jnp.maximum(jnp.dot(z, w3, preferred_element_type=jnp.float32) + b3, 0.0)
    z2 = jnp.dot(z1, w4, preferred_element_type=jnp.float32) + b4

    # numerically stable sigmoid; divide via EUP reciprocal slot
    e = jnp.exp(-jnp.abs(z2))
    s_neg = e * pl.reciprocal(1.0 + e, approx=False)            # sigmoid(-|z2|)
    xrec = jnp.where(z2 >= 0.0, 1.0 - s_neg, s_neg)

    # --- single packed output block: [B, F | 2E] ---
    out_ref[:, :F] = xrec
    out_ref[:, F:] = mulv


def prepack_params(params, num_features, hidden_layer, encoded_dimensions):
    """One-time repack of all constant parameters into a single [R, C] slab.

    Done OUTSIDE the per-call hot path so every forward issues exactly two
    input DMAs (activations, slab) instead of rebuilding packed layouts.
    """
    F, H, E = num_features, hidden_layer, encoded_dimensions

    # Fuse the two head weights/biases -> one [H, 2E] matmul in-kernel.
    whead = jnp.concatenate([params["wmu"], params["wlv"]], axis=1)   # [H, 2E]
    bhead = jnp.concatenate([params["bmu"], params["blv"]], axis=1)   # [1, 2E]

    C = max(H, 2 * E, F)
    # 8-aligned row offsets for each section (clean sublane-aligned slices).
    o_w1 = 0
    o_wh = o_w1 + _round8(F)
    o_w3 = o_wh + _round8(H)
    o_w4 = o_w3 + _round8(E)
    o_rows = o_w4 + _round8(H)
    R = o_rows + 8                                    # 6 param rows, padded to 8

    slab = jnp.zeros((R, C), jnp.float32)

    def put(s, r0, a):
        return s.at[r0:r0 + a.shape[0], :a.shape[1]].set(a)

    slab = put(slab, o_w1, params["w1"])
    slab = put(slab, o_wh, whead)
    slab = put(slab, o_w3, params["w3"])
    slab = put(slab, o_w4, params["w4"])
    slab = put(slab, o_rows + ROW_B1, params["b1"])
    slab = put(slab, o_rows + ROW_GAMMA, params["gamma"])
    slab = put(slab, o_rows + ROW_BETA, params["beta"])
    slab = put(slab, o_rows + ROW_BHEAD, bhead)
    slab = put(slab, o_rows + ROW_B3, params["b3"])
    slab = put(slab, o_rows + ROW_B4, params["b4"])

    offs = (o_w1, o_wh, o_w3, o_w4, o_rows)
    dims = (F, H, E)
    return slab, offs, dims


def vae_forward(x, eps, packed):
    """Returns (x_reconstructed, mu, logvar); all float32."""
    slab, offs, (F, H, E) = packed
    B = x.shape[0]

    # Pack activations + noise into one [B, F+E] block -> single input DMA.
    xe = jnp.concatenate([x, eps], axis=1)

    out = pl.pallas_call(
        functools.partial(_vae_kernel, F, E, H, offs),
        out_shape=jax.ShapeDtypeStruct((B, F + 2 * E), jnp.float32),
        in_specs=[pl.BlockSpec(xe.shape, lambda: (0, 0)),
                  pl.BlockSpec(slab.shape, lambda: (0, 0))],
        out_specs=pl.BlockSpec((B, F + 2 * E), lambda: (0, 0)),
    )(xe, slab)

    return out[:, :F], out[:, F:F + E], out[:, F + E:]


def init_params(key, num_features, hidden_layer, encoded_dimensions):
    """Deterministic synthetic params. PyTorch Linear weight is [out, in];
    we store the transpose [in, out] for row-major matmul in-kernel.
    Biases/gamma/beta are kept as [1, dim] rows for clean lane broadcasting."""
    ks = jax.random.split(key, 12)

    def lin(kw, kb, din, dout):
        bound = 1.0 / jnp.sqrt(din)
        w = jax.random.uniform(kw, (din, dout), jnp.float32, -bound, bound)
        b = jax.random.uniform(kb, (1, dout), jnp.float32, -bound, bound)
        return w, b

    w1, b1 = lin(ks[0], ks[1], num_features, hidden_layer)
    wmu, bmu = lin(ks[2], ks[3], hidden_layer, encoded_dimensions)
    wlv, blv = lin(ks[4], ks[5], hidden_layer, encoded_dimensions)
    w3, b3 = lin(ks[6], ks[7], encoded_dimensions, hidden_layer)
    w4, b4 = lin(ks[8], ks[9], hidden_layer, num_features)
    gamma = jnp.ones((1, hidden_layer), jnp.float32)   # BatchNorm1d weight init
    beta = jnp.zeros((1, hidden_layer), jnp.float32)   # BatchNorm1d bias init
    return dict(w1=w1, b1=b1, gamma=gamma, beta=beta,
                wmu=wmu, bmu=bmu, wlv=wlv, blv=blv,
                w3=w3, b3=b3, w4=w4, b4=b4)


def reference_forward(x, eps, p):
    """Pure-JAX reference mirroring the PyTorch forward (training-mode BN)."""
    h = x @ p["w1"] + p["b1"]
    mean = jnp.mean(h, axis=0, keepdims=True)
    var = jnp.mean((h - mean) ** 2, axis=0, keepdims=True)
    h = (h - mean) / jnp.sqrt(var + BN_EPS) * p["gamma"] + p["beta"]
    h = jnp.maximum(h, 0.0)
    mu = h @ p["wmu"] + p["bmu"]
    logvar = h @ p["wlv"] + p["blv"]
    z = mu + eps * jnp.exp(0.5 * logvar)
    z1 = jnp.maximum(z @ p["w3"] + p["b3"], 0.0)
    z2 = z1 @ p["w4"] + p["b4"]
    return jax.nn.sigmoid(z2), mu, logvar


if __name__ == "__main__":
    B, NUM_FEATURES, HIDDEN, ENCODED = 8, 32, 16, 8

    key = jax.random.PRNGKey(0)
    k_x, k_eps, k_p = jax.random.split(key, 3)

    x = jax.random.normal(k_x, (B, NUM_FEATURES), jnp.float32)
    eps = jax.random.normal(k_eps, (B, ENCODED), jnp.float32)   # randn_like(std)
    params = init_params(k_p, NUM_FEATURES, HIDDEN, ENCODED)

    # One-time parameter repack (hoisted out of the per-call hot path).
    packed = prepack_params(params, NUM_FEATURES, HIDDEN, ENCODED)
    packed = jax.tree_util.tree_map(
        lambda a: jax.device_put(a) if isinstance(a, jnp.ndarray) else a, packed)

    fwd = jax.jit(lambda xx, ee: vae_forward(xx, ee, packed))

    x_rec, mu, logvar = fwd(x, eps)
    jax.block_until_ready((x_rec, mu, logvar))

    # correctness check vs pure-JAX reference
    xr_ref, mu_ref, lv_ref = reference_forward(x, eps, params)
    assert jnp.allclose(x_rec, xr_ref, atol=1e-5, rtol=1e-5)
    assert jnp.allclose(mu, mu_ref, atol=1e-5, rtol=1e-5)
    assert jnp.allclose(logvar, lv_ref, atol=1e-5, rtol=1e-5)

    print("KERNEL_OK")
</pallas_src>

<mosaic_0001>
module attributes {stable_mosaic.version = 11 : i64} {
  func.func @_vae_kernel(%arg0: memref<8x40xf32, #tpu.memory_space<vmem>>, %arg1: memref<80x32xf32, #tpu.memory_space<vmem>>, %arg2: memref<8x48xf32, #tpu.memory_space<vmem>>) attributes {dimension_semantics = [], scalar_prefetch = 0 : i64, scratch_operands = 0 : i64, tpu.core_type = #tpu.core_type<tc>} {
    %c0 = arith.constant 0 : index
    %c0_0 = arith.constant 0 : index
    %0 = vector.load %arg0[%c0, %c0_0] : memref<8x40xf32, #tpu.memory_space<vmem>>, vector<8x32xf32>
    %c0_1 = arith.constant 0 : index
    %c32 = arith.constant 32 : index
    %1 = vector.load %arg0[%c0_1, %c32] : memref<8x40xf32, #tpu.memory_space<vmem>>, vector<8x8xf32>
    %c0_2 = arith.constant 0 : index
    %c0_3 = arith.constant 0 : index
    %2 = vector.load %arg1[%c0_2, %c0_3] : memref<80x32xf32, #tpu.memory_space<vmem>>, vector<32x16xf32>
    %c32_4 = arith.constant 32 : index
    %c0_5 = arith.constant 0 : index
    %3 = vector.load %arg1[%c32_4, %c0_5] : memref<80x32xf32, #tpu.memory_space<vmem>>, vector<16x16xf32>
    %c48 = arith.constant 48 : index
    %c0_6 = arith.constant 0 : index
    %4 = vector.load %arg1[%c48, %c0_6] : memref<80x32xf32, #tpu.memory_space<vmem>>, vector<8x16xf32>
    %c56 = arith.constant 56 : index
    %c0_7 = arith.constant 0 : index
    %5 = vector.load %arg1[%c56, %c0_7] : memref<80x32xf32, #tpu.memory_space<vmem>>, vector<16x32xf32>
    %c72 = arith.constant 72 : index
    %c0_8 = arith.constant 0 : index
    %6 = vector.load %arg1[%c72, %c0_8] : memref<80x32xf32, #tpu.memory_space<vmem>>, vector<1x16xf32>
    %c73 = arith.constant 73 : index
    %c0_9 = arith.constant 0 : index
    %7 = vector.load %arg1[%c73, %c0_9] : memref<80x32xf32, #tpu.memory_space<vmem>>, vector<1x16xf32>
    %c74 = arith.constant 74 : index
    %c0_10 = arith.constant 0 : index
    %8 = vector.load %arg1[%c74, %c0_10] : memref<80x32xf32, #tpu.memory_space<vmem>>, vector<1x16xf32>
    %c75 = arith.constant 75 : index
    %c0_11 = arith.constant 0 : index
    %9 = vector.load %arg1[%c75, %c0_11] : memref<80x32xf32, #tpu.memory_space<vmem>>, vector<1x16xf32>
    %c76 = arith.constant 76 : index
    %c0_12 = arith.constant 0 : index
    %10 = vector.load %arg1[%c76, %c0_12] : memref<80x32xf32, #tpu.memory_space<vmem>>, vector<1x16xf32>
    %c77 = arith.constant 77 : index
    %c0_13 = arith.constant 0 : index
    %11 = vector.load %arg1[%c77, %c0_13] : memref<80x32xf32, #tpu.memory_space<vmem>>, vector<1x32xf32>
    %cst = arith.constant dense<0.000000e+00> : vector<8x16xf32>
    %12 = tpu.matmul %0, %2, %cst {dimension_numbers = #tpu.dot_dimension_numbers<[1], [0], [0], [1], [0, 0, 1, 1], [], []>} : vector<8x32xf32>, vector<32x16xf32>, vector<8x16xf32> -> vector<8x16xf32>
    %13 = vector.broadcast %6 : vector<1x16xf32> to vector<8x16xf32>
    %14 = arith.addf %12, %13 : vector<8x16xf32>
    %cst_14 = arith.constant dense<0.000000e+00> : vector<16xf32>
    %15 = vector.multi_reduction <add>, %14, %cst_14 [0] : vector<8x16xf32> to vector<16xf32>
    %16 = vector.shape_cast %15 : vector<16xf32> to vector<1x16xf32>
    %cst_15 = arith.constant 8.000000e+00 : f32
    %17 = vector.broadcast %cst_15 : f32 to vector<1x16xf32>
    %18 = arith.divf %16, %17 : vector<1x16xf32>
    %19 = vector.broadcast %18 : vector<1x16xf32> to vector<8x16xf32>
    %20 = arith.subf %14, %19 : vector<8x16xf32>
    %21 = arith.mulf %20, %20 : vector<8x16xf32>
    %cst_16 = arith.constant dense<0.000000e+00> : vector<16xf32>
    %22 = vector.multi_reduction <add>, %21, %cst_16 [0] : vector<8x16xf32> to vector<16xf32>
    %23 = vector.shape_cast %22 : vector<16xf32> to vector<1x16xf32>
    %cst_17 = arith.constant 8.000000e+00 : f32
    %24 = vector.broadcast %cst_17 : f32 to vector<1x16xf32>
    %25 = arith.divf %23, %24 : vector<1x16xf32>
    %cst_18 = arith.constant 9.99999974E-6 : f32
    %26 = vector.broadcast %cst_18 : f32 to vector<1x16xf32>
    %27 = arith.addf %25, %26 : vector<1x16xf32>
    %28 = math.rsqrt %27 : vector<1x16xf32>
    %29 = arith.mulf %7, %28 : vector<1x16xf32>
    %30 = vector.broadcast %29 : vector<1x16xf32> to vector<8x16xf32>
    %31 = arith.mulf %20, %30 : vector<8x16xf32>
    %32 = vector.broadcast %8 : vector<1x16xf32> to vector<8x16xf32>
    %33 = arith.addf %31, %32 : vector<8x16xf32>
    %cst_19 = arith.constant 0.000000e+00 : f32
    %34 = vector.broadcast %cst_19 : f32 to vector<8x16xf32>
    %35 = arith.maximumf %33, %34 : vector<8x16xf32>
    %cst_20 = arith.constant dense<0.000000e+00> : vector<8x16xf32>
    %36 = tpu.matmul %35, %3, %cst_20 {dimension_numbers = #tpu.dot_dimension_numbers<[1], [0], [0], [1], [0, 0, 1, 1], [], []>} : vector<8x16xf32>, vector<16x16xf32>, vector<8x16xf32> -> vector<8x16xf32>
    %37 = vector.broadcast %9 : vector<1x16xf32> to vector<8x16xf32>
    %38 = arith.addf %36, %37 : vector<8x16xf32>
    %39 = vector.extract_strided_slice %38 {offsets = [0, 0], sizes = [8, 8], strides = [1, 1]} : vector<8x16xf32> to vector<8x8xf32>
    %40 = vector.extract_strided_slice %38 {offsets = [0, 8], sizes = [8, 8], strides = [1, 1]} : vector<8x16xf32> to vector<8x8xf32>
    %cst_21 = arith.constant 5.000000e-01 : f32
    %41 = vector.broadcast %cst_21 : f32 to vector<8x8xf32>
    %42 = arith.mulf %41, %40 : vector<8x8xf32>
    %43 = math.exp %42 : vector<8x8xf32>
    %44 = arith.mulf %1, %43 : vector<8x8xf32>
    %45 = arith.addf %39, %44 : vector<8x8xf32>
    %cst_22 = arith.constant dense<0.000000e+00> : vector<8x16xf32>
    %46 = tpu.matmul %45, %4, %cst_22 {dimension_numbers = #tpu.dot_dimension_numbers<[1], [0], [0], [1], [0, 0, 1, 1], [], []>} : vector<8x8xf32>, vector<8x16xf32>, vector<8x16xf32> -> vector<8x16xf32>
    %47 = vector.broadcast %10 : vector<1x16xf32> to vector<8x16xf32>
    %48 = arith.addf %46, %47 : vector<8x16xf32>
    %cst_23 = arith.constant 0.000000e+00 : f32
    %49 = vector.broadcast %cst_23 : f32 to vector<8x16xf32>
    %50 = arith.maximumf %48, %49 : vector<8x16xf32>
    %cst_24 = arith.constant dense<0.000000e+00> : vector<8x32xf32>
    %51 = tpu.matmul %50, %5, %cst_24 {dimension_numbers = #tpu.dot_dimension_numbers<[1], [0], [0], [1], [0, 0, 1, 1], [], []>} : vector<8x16xf32>, vector<16x32xf32>, vector<8x32xf32> -> vector<8x32xf32>
    %52 = vector.broadcast %11 : vector<1x32xf32> to vector<8x32xf32>
    %53 = arith.addf %51, %52 : vector<8x32xf32>
    %54 = math.absf %53 : vector<8x32xf32>
    %cst_25 = arith.constant 0.000000e+00 : f32
    %55 = vector.broadcast %cst_25 : f32 to vector<8x32xf32>
    %56 = arith.subf %55, %54 : vector<8x32xf32>
    %57 = math.exp %56 : vector<8x32xf32>
    %cst_26 = arith.constant 1.000000e+00 : f32
    %58 = vector.broadcast %cst_26 : f32 to vector<8x32xf32>
    %59 = arith.addf %58, %57 : vector<8x32xf32>
    %60 = tpu.reciprocal %59 : vector<8x32xf32> -> vector<8x32xf32>
    %61 = arith.mulf %57, %60 : vector<8x32xf32>
    %cst_27 = arith.constant 0.000000e+00 : f32
    %62 = vector.broadcast %cst_27 : f32 to vector<8x32xf32>
    %63 = arith.cmpf oge, %53, %62 : vector<8x32xf32>
    %cst_28 = arith.constant 1.000000e+00 : f32
    %64 = vector.broadcast %cst_28 : f32 to vector<8x32xf32>
    %65 = arith.subf %64, %61 : vector<8x32xf32>
    %66 = arith.select %63, %65, %61 : vector<8x32xi1>, vector<8x32xf32>
    %c0_29 = arith.constant 0 : index
    %c0_30 = arith.constant 0 : index
    %67 = vector.load %arg2[%c0_29, %c0_30] : memref<8x48xf32, #tpu.memory_space<vmem>>, vector<8x32xf32>
    tpu.vector_store %arg2[%c0_29, %c0_30], %66 {strides = array<i32>} : memref<8x48xf32, #tpu.memory_space<vmem>>, vector<8x32xf32>,
    %c0_31 = arith.constant 0 : index
    %c32_32 = arith.constant 32 : index
    %68 = vector.load %arg2[%c0_31, %c32_32] : memref<8x48xf32, #tpu.memory_space<vmem>>, vector<8x16xf32>
    tpu.vector_store %arg2[%c0_31, %c32_32], %38 {strides = array<i32>} : memref<8x48xf32, #tpu.memory_space<vmem>>, vector<8x16xf32>,
    return
  }
}

</mosaic_0001>

<bundles_post_ra>
// kernel: _lambda_.1
= control target key start
LH: loop header
LB: loop body
LE: loop exit
PB: predicated region body
PF: predicated region fallthrough
CT: control target
= control target key end

     0   :  { %7 = vsyncpa [#allocation3], 0  ;;  %s526_s9 = smov [#allocation2]   ;;  %s585_s0 = inlined_call_operand.vmem [shape: f32[8,40], index: 0, kind: input, shape index: {}]   ;;  %s586_s1 = inlined_call_operand.hbm [shape: f32[80,32], index: 1, kind: input, shape index: {}]   ;;  %s587_s2 = inlined_call_operand.vmem [shape: f32[8,48], index: 2, kind: output, shape index: {}]  }
   0x1   :  { %s15_s10 = sshll.u32 %s526_s9, 4  ;;  %s502_s13 = scalar_lea.hbm %s586_s1, 1280  ;;  %s16_s10 = int_to_ptr.vmem [resolvable:$true] %s15_s10 }
   0x2   :  { %p503_p0 = scmp.ne.s32.totalorder %s586_s1, %s502_s13  ;;  %p506_p1 = scmp.lt.u32.totalorder %s502_s13, %s586_s1 }
   0x4   :  { %p508_p2 = pnand %p506_p1, %p503_p0 }
   0x6   :  { %511 = shalt.err (!%p508_p2)
}
   0x7   :  { %s512_s18 = scalar_lea.vmem %s16_s10, 1280  ;;  %p517_p4 = scmp.lt.s32.totalorder %s16_s10, %s16_s10 }
   0x8   :  { %p513_p3 = scmp.ne.s32.totalorder %s16_s10, %s512_s18  ;;  %p518_p5 = scmp.lt.s32.totalorder %s512_s18, %s512_s18 }
   0xa   :  { %p519_p6 = por %p518_p5, %p517_p4 }
   0xc   :  { %p520_p7 = pnand %p519_p6, %p513_p3 }
   0xe   :  { %523 = shalt.err (!%p520_p7)
}
   0xf   :  { %s527_s19 = smov 128   ;;  %s528_s20 = smov 8  }
  0x10   :  { %21 = dma.hbm_to_vmem [thread:$0]  %s586_s1, 1280, %s16_s10, [#allocation3], %s527_s19, %s527_s19, %s528_s20  }
  0x11   :  { %524 = dma.done.wait [#allocation3], 1280  }
  0x12   :  { %525 = vsyncadd [#allocation3], 4294966016  ;;  %v529_v0 = vmov 0.0|0.0   ;;  %vm530_vm0 = vmmov 0   ;;  %v531_v1 = vmov 0.0   ;;  %v26_v2 = vld [vmem:[#allocation2] sm:$0xff]  ;;  %v142_v35 = vlaneseq }
  0x13   :  { %473 = vmatprep.subr.bf16.mxu0 %v529_v0  ;;  %451 = vmatprep.mubr.msk.f32.mxu0 %vm530_vm0, %v531_v1  ;;  %v27_v3 = vld [vmem:[#allocation2 + $0x8] sm:$0xff]  ;;  %v28_v4 = vld [vmem:[#allocation2 + $0x10] sm:$0xff]  ;;  %v29_v6 = vld [vmem:[#allocation2 + $0x18] sm:$0xff]  ;;  %vm45_vm1 = vcmask 261120   ;;  %vm119_vm2 = vcmask 130048   ;;  %s533_s24 = smov 24  }
  0x14   :  { %479 = vmatprep.subr.bf16.mxu1 %v529_v0  ;;  %458 = vmatprep.mubr.msk.f32.mxu1 %vm530_vm0, %v531_v1  ;;  %v474_v5 = vpack.c.bf16 %v27_v3, %v26_v2  ;;  %v477_v7 = vpack.c.bf16 %v29_v6, %v28_v4  ;;  %v567_v8 = vld [vmem:[%s585_s0] sm:$0xff]  ;;  %v30_v9 = vld [vmem:[#allocation2 + $0x20] sm:$0xff]  ;;  %v31_v10 = vld [vmem:[#allocation2 + $0x28] sm:$0xff]  ;;  %v143_v36 = vshrl.u32 %v142_v35, 7  ;;  %s532_s0 = smov 32   ;;  %s534_s25 = smov 96  }
  0x15   :  { %v480_v11 = vpack.c.bf16 %v31_v10, %v30_v9  ;;  %v421_v12 = vld [vmem:[#allocation2 + $0x48] ss:$0 sm:$0xff]  ;;  %v36_v37 = vld [vmem:[#allocation2 + $0x49] sm:$0x1]  ;;  %v423_v42 = vld [vmem:[#allocation2 + $0x4a] ss:$0 sm:$0xff] }
  0x16   :  { %475 = vmatpush3.bf16.msra.mxu0 %v474_v5  ;;  %v144_v38 = vsub.s32 0, %v143_v36  ;;  %v424_v46 = vld [vmem:[#allocation2 + $0x4b] ss:$0 sm:$0xff]  ;;  %v32_v52 = vld [vmem:[#allocation2 + $0x30] sm:$0xff]  ;;  %vm247_vm3 = vcmask 64512   ;;  %v33_v58 = vld [vmem:[#allocation2 + $0x38] sm:$0xff] }
  0x17   :  { %476 = vmatprep.subr.bf16.mxu0 %v529_v0  ;;  %481 = vmatpush3.bf16.msra.mxu1 %v480_v11  ;;  %v34_v59 = vld [vmem:[#allocation2 + $0x40] sm:$0xff]  ;;  %v426_v61 = vld [vmem:[#allocation2 + $0x4c] ss:$0 sm:$0xff]  ;;  %v428_v2 = vld [vmem:[#allocation2 + $0x4d] ss:$0 sm:$0xff]  ;;  %vm414_vm5 = vcmask 392448  }
  0x18   :  { %461 = vmatprep.subr.mxu1 %v531_v1  ;;  %v483_v60 = vpack.c.bf16 %v34_v59, %v33_v58 }
  0x1a   :  { %478 = vmatpush3.bf16.msra.mxu0 %v477_v7 }
  0x1b   :  { %482 = vmatprep.subr.bf16.mxu0 %v529_v0 }
  0x1d   :  { %452 = vmatmul.mubr.msk.f32.vlgmr.msra.gmra.mrb[0].mxu0 %vm45_vm1, %v567_v8 }
  0x1e   :  { %470 = vmatprep.mubr.msk.f32.mxu0 %vm530_vm0, %v531_v1  ;;  %484 = vmatpush3.bf16.msra.mxu0 %v483_v60 }
  0xf0   :  { %v115_v13 = vpop.f32.mrb[0].mxu0 }
  0xf1   :  { %v116_v14 = vadd.f32 %v421_v12, %v115_v13  ;;  %v453_v15 = vpop.f32.mrb[1].mxu0 }
  0xf3   :  { %v120_v16 = vsel %vm119_vm2, %v116_v14, 0.0 }
  0xf4   :  { %v121_v17 = vrot.slane %v120_v16, 4 }
  0xf6   :  { %v122_v18 = vadd.f32 %v121_v17, %v120_v16 }
  0xf8   :  { %v123_v19 = vrot.slane %v122_v18, 2 }
  0xfa   :  { %v124_v20 = vadd.f32 %v123_v19, %v122_v18 }
  0xfc   :  { %v125_v21 = vrot.slane %v124_v20, 1 }
  0xfe   :  { %v126_v22 = vadd.f32 %v125_v21, %v124_v20 }
 0x100   :  { %v128_v23 = vmul.f32 0.125, %v126_v22 }
 0x102   :  { %v129_v24 = vsub.f32 %v116_v14, %v128_v23 }
 0x104   :  { %v130_v25 = vmul.f32 %v129_v24, %v129_v24 }
 0x106   :  { %v131_v26 = vsel %vm119_vm2, %v130_v25, 0.0 }
 0x107   :  { %v132_v27 = vrot.slane %v131_v26, 4 }
 0x109   :  { %v133_v28 = vadd.f32 %v132_v27, %v131_v26 }
 0x10b   :  { %v134_v29 = vrot.slane %v133_v28, 2 }
 0x10d   :  { %v135_v30 = vadd.f32 %v134_v29, %v133_v28 }
 0x10f   :  { %v136_v31 = vrot.slane %v135_v30, 1 }
 0x111   :  { %v137_v32 = vadd.f32 %v136_v31, %v135_v30 }
 0x113   :  { %v138_v33 = vmul.f32 0.125, %v137_v32 }
 0x115   :  { %v139_v34 = vadd.f32 1e-05, %v138_v33 }
 0x117   :  { %494 = vrsqrt.f32 %v139_v34 }
 0x121   :  { %v495_v39 = vpop.eup %494 }
 0x122   :  { %v141_v40 = vmul.f32 %v495_v39, %v36_v37 }
 0x124   :  { %v145_v41 = vrot.slane %v141_v40, %v144_v38 }
 0x126   :  { %v146_v43 = vmul.f32 %v145_v41, %v129_v24 }
 0x128   :  { %v151_v44 = vadd.f32 %v423_v42, %v146_v43 }
 0x12a   :  { %v152_v45 = vmax.f32 %v151_v44, 0.0 }
 0x12c   :  { %459 = vmatmul.mubr.msk.f32.vlgmr.msra.gmra.mrb[0].mxu1 %vm119_vm2, %v152_v45 }
 0x12d   :  { %463 = vmatprep.mubr.msk.f32.mxu1 %vm530_vm0, %v531_v1  ;;  %462 = vmatpush3.msra.mxu1 %v32_v52 }
 0x1ff   :  { %v226_v47 = vpop.f32.mrb[0].mxu1 }
 0x200   :  { %v227_v48 = vadd.f32 %v424_v46, %v226_v47  ;;  %v460_v49 = vpop.f32.mrb[1].mxu1 }
 0x202   :  { %v230_v50 = vmul.f32 0.5, %v227_v48  ;;  %411 = vrot.lane.b32.xlu1 %v227_v48, %s532_s0 }
 0x204   :  { %v231_v51 = vmul.f32 1.442695, %v230_v50 }
 0x206   :  { %496 = vpow2.f32 %v231_v51 }
 0x210   :  { %v497_v53 = vpop.eup %496 }
 0x211   :  { %234 = vrot.lane.b32.xlu0 %v497_v53, %s533_s24 }
 0x274   :  { %v412_v15 = vpop.permute.xlu1 %411 }
 0x283   :  { %v235_v54 = vpop.permute.xlu0 %234 }
 0x284   :  { %v237_v55 = vmul.f32 %v235_v54, %v567_v8 }
 0x286   :  { %239 = vrot.lane.b32.xlu0 %v237_v55, %s534_s25 }
 0x2f8   :  { %v240_v56 = vpop.permute.xlu0 %239 }
 0x2f9   :  { %v242_v57 = vadd.f32 %v240_v56, %v227_v48 }
 0x2fb   :  { %464 = vmatmul.mubr.msk.f32.vlgmr.msra.gmra.mrb[2].mxu1 %vm247_vm3, %v242_v57 }
 0x3ce   :  { %v317_v62 = vpop.f32.mrb[2].mxu1 }
 0x3cf   :  { %v318_v63 = vadd.f32 %v426_v61, %v317_v62  ;;  %v465_v0 = vpop.f32.mrb[3].mxu1 }
 0x3d1   :  { %v321_v1 = vmax.f32 %v318_v63, 0.0 }
 0x3d3   :  { %471 = vmatmul.mubr.msk.f32.vlgmr.msra.gmra.mrb[2].mxu0 %vm119_vm2, %v321_v1 }
 0x4a6   :  { %v395_v3 = vpop.f32.mrb[2].mxu0 }
 0x4a7   :  { %v396_v4 = vadd.f32 %v428_v2, %v395_v3  ;;  %v472_v5 = vpop.f32.mrb[3].mxu0 }
 0x4a9   :  { %v399_v6 = vand.u32 2147483647, %v396_v4  ;;  %vm406_vm4 = vcmp.ge.f32.partialorder %v396_v4, 0.0 }
 0x4ab   :  { %v400_v7 = vsub.f32 0.0, %v399_v6 }
 0x4ad   :  { %v401_v8 = vmul.f32 1.442695, %v400_v7 }
 0x4af   :  { %498 = vpow2.f32 %v401_v8 }
 0x4b9   :  { %v499_v9 = vpop.eup %498 }
 0x4ba   :  { %v403_v10 = vadd.f32 1.0, %v499_v9 }
 0x4bc   :  { %500 = vrcp.f32 %v403_v10 }
 0x4c6   :  { %v501_v11 = vpop.eup %500 }
 0x4c7   :  { %v405_v12 = vmul.f32 %v501_v11, %v499_v9 }
 0x4c9   :  { %v407_v13 = vsub.f32 1.0, %v405_v12 }
 0x4cb   :  { %v408_v14 = vsel %vm406_vm4, %v407_v13, %v405_v12 }
 0x4cc   :  { %409 = vst.msk [vmem:[%s587_s2] sm:$0xff] %vm45_vm1, %v408_v14 }
 0x4cd   :  { %415 = vst.msk [vmem:[%s587_s2] sm:$0xff] %vm414_vm5, %v412_v15 }
 0x4ce   :  { %420 = vsyncpa [#allocation3], 1 }

</bundles_post_ra>
